<compile_context>
chip_gen: v6e
topology: v6e:2x2x1
jax: 0.10.0
libtpu: 0.0.40
codegen_flags: <defaults>
</compile_context>

<pallas_src>
from functools import partial

import jax
import jax.numpy as jnp
from jax.experimental import pallas as pl
from jax.experimental.pallas import tpu as pltpu


def _round_up(x, m):
    return ((x + m - 1) // m) * m


def behavior_mlp_kernel(x_ref,
                        w1_ref, w2_ref, w3_ref, w4_ref, w5_ref,
                        b_ref, out_ref, *, action_size):
    """One batch tile: 5 dense layers (ReLU between) + row-wise log-softmax.

    x_ref   : (TM, in_dim)    bf16  activation tile (streamed, double-buffered)
    wN_ref  : (in_N, out_N)   bf16  VMEM-resident across the grid; w5 lane-padded to 128
    b_ref   : (5, max_width)  f32   row i = bias of layer i, zero-padded on lanes
    out_ref : (TM, out_pad)   f32   lane-dense 128-wide slab -> unmasked vst
    """

    def dense(h, w_ref, row):
        n = w_ref.shape[1]
        # bf16 MXU operands, f32 accumulation; bias add stays f32 (v5e has no bf16 VALU).
        y = jnp.dot(h, w_ref[...], preferred_element_type=jnp.float32)
        return y + b_ref[row:row + 1, 0:n]

    # Carry inter-layer activations in bf16: cast once right after each (f32) ReLU.
    # The only bf16 ops are the casts and the MXU operands, so this is safe on v5e too.
    h = x_ref[...]
    h = jnp.maximum(dense(h, w1_ref, 0), 0.0).astype(jnp.bfloat16)
    h = jnp.maximum(dense(h, w2_ref, 1), 0.0).astype(jnp.bfloat16)
    h = jnp.maximum(dense(h, w3_ref, 2), 0.0).astype(jnp.bfloat16)
    h = jnp.maximum(dense(h, w4_ref, 3), 0.0).astype(jnp.bfloat16)
    logits = dense(h, w5_ref, 4)      # (TM, out_pad) f32; lanes >= action_size are padding

    # Numerically-stable LogSoftmax over the *real* action lanes only (f32).
    real = logits[:, :action_size]
    m = jnp.max(real, axis=-1, keepdims=True)
    lse = m + jnp.log(jnp.sum(jnp.exp(real - m), axis=-1, keepdims=True))
    # Store the full 128-lane slab (unmasked, lane-dense); wrapper slices off pad lanes.
    out_ref[...] = logits - lse


def init_behavior_params(key, state_size, command_size, action_size):
    """PyTorch-Linear-style init: U(-1/sqrt(fan_in), 1/sqrt(fan_in)) for W and b."""
    sizes = [state_size + command_size, 64, 64, 64, 32, action_size]
    params = []
    for i in range(len(sizes) - 1):
        fan_in, fan_out = sizes[i], sizes[i + 1]
        key, kw, kb = jax.random.split(key, 3)
        bound = 1.0 / jnp.sqrt(jnp.float32(fan_in))
        w = jax.random.uniform(kw, (fan_in, fan_out), jnp.float32, -bound, bound)
        b = jax.random.uniform(kb, (1, fan_out), jnp.float32, -bound, bound)
        params.append((w, b))
    return params


def prepare_behavior_params(params):
    """One-time prep (hoisted OUT of the per-call path):
    cast weights to bf16, zero-pad the final layer's output dim to a multiple of 128
    lanes (lane-dense stores), and pack the 5 biases into one (5, max_width) f32 operand.
    """
    n_layers = len(params)
    action_size = int(params[-1][0].shape[1])
    out_pad = _round_up(action_size, 128)

    weights = []
    for i, (w, _) in enumerate(params):
        w = w.astype(jnp.bfloat16)
        if i == n_layers - 1:
            w = jnp.pad(w, ((0, 0), (0, out_pad - w.shape[1])))
        weights.append(w)

    max_w = max(int(w.shape[1]) for w in weights)
    rows = [jnp.pad(b[0].astype(jnp.float32), (0, max_w - b.shape[1]))
            for _, b in params]
    bias_pack = jnp.stack(rows, axis=0)           # (5, max_w) f32

    return tuple(weights), bias_pack, action_size


def _batch_tile(batch):
    """Rows per grid step.
    * batch <= 16: a single exact tile (block dims == array dims, exempt from tiling rules)
    * else: ~ceil(batch/2) rounded to a multiple of 16 (bf16 sublane tiling), capped at
      2048, so the grid has >= 2 steps and v7x can shard the batch across its 2 TCs while
      each step stays large enough to amortize the ~0.35us per-step overhead.
    """
    if batch <= 16:
        return max(batch, 1)
    return min(2048, _round_up(-(-batch // 2), 16))


@partial(jax.jit, static_argnames=("action_size",))
def behavior_forward(features, weights, bias_pack, *, action_size):
    """features: [batch, state_size + command_size] f32 -> log-probs [batch, action_size]."""
    batch, in_dim = features.shape
    assert len(weights) == 5
    out_pad = int(weights[-1].shape[1])           # final layer padded to a 128-lane slab

    x = features.astype(jnp.bfloat16)             # halve the per-step activation DMA
    tm = _batch_tile(batch)
    # When batch % tm != 0 the last tile runs log-softmax on uninitialized padded rows.
    # That is safe: every op is row-wise and Pallas masks the out-of-bounds rows on store.
    grid = (pl.cdiv(batch, tm),)

    def const_spec(shape):
        # Same block index every grid step -> DMA'd once, stays VMEM-resident (~40-80 KB).
        return pl.BlockSpec(shape, lambda i: (0, 0))

    in_specs = [pl.BlockSpec((tm, in_dim), lambda i: (i, 0))]
    in_specs += [const_spec(w.shape) for w in weights]
    in_specs += [const_spec(bias_pack.shape)]

    flops = 2 * batch * sum(int(w.shape[0]) * int(w.shape[1]) for w in weights)
    bytes_accessed = (batch * in_dim * 2
                      + sum(int(w.size) * 2 for w in weights)
                      + int(bias_pack.size) * 4
                      + batch * out_pad * 4)

    out = pl.pallas_call(
        partial(behavior_mlp_kernel, action_size=action_size),
        out_shape=jax.ShapeDtypeStruct((batch, out_pad), jnp.float32),
        grid=grid,
        in_specs=in_specs,
        out_specs=pl.BlockSpec((tm, out_pad), lambda i: (i, 0)),
        compiler_params=pltpu.CompilerParams(
            dimension_semantics=("parallel",)),   # v7x: shard batch tiles across 2 TCs
        cost_estimate=pl.CostEstimate(
            flops=flops,
            transcendentals=batch * (action_size + 1),
            bytes_accessed=bytes_accessed),
    )(x, *weights, bias_pack)

    # Lane-dense slab -> the module's (batch, action_size) log-probs (free-ish slice).
    return out[:, :action_size]


def behavior_forward_ref(features, params, matmul_dtype=jnp.float32):
    h = features
    for i, (w, b) in enumerate(params):
        h = jnp.dot(h.astype(matmul_dtype), w.astype(matmul_dtype),
                    preferred_element_type=jnp.float32) + b
        if i < len(params) - 1:
            h = jnp.maximum(h, 0.0)
    return jax.nn.log_softmax(h, axis=-1)


if __name__ == "__main__":
    state_size = 8
    command_size = 2
    action_size = 4

    key = jax.random.PRNGKey(0)
    key, kx = jax.random.split(key)

    params = init_behavior_params(key, state_size, command_size, action_size)
    # One-time prep (per perf review: keep casts / bias packing out of the hot path).
    weights, bias_pack, act = prepare_behavior_params(params)

    for batch in (8, 40):   # single exact tile; multi-tile grid with a partial last block
        kb = jax.random.fold_in(kx, batch)
        features = jax.random.normal(kb, (batch, state_size + command_size), jnp.float32)

        out = jax.block_until_ready(
            behavior_forward(features, weights, bias_pack, action_size=act))
        assert out.shape == (batch, action_size)

        # Reference with the same bf16-operand / f32-accumulate arithmetic -> tight tol.
        ref_bf16 = behavior_forward_ref(features, params, jnp.bfloat16)
        err = float(jnp.max(jnp.abs(out - ref_bf16)))
        assert jnp.allclose(out, ref_bf16, atol=2e-3, rtol=2e-3), err

        # Full-f32 reference -> loose tolerance (bf16 MXU operands).
        ref_f32 = behavior_forward_ref(features, params, jnp.float32)
        assert jnp.allclose(out, ref_f32, atol=5e-2, rtol=5e-2)

        # Log-probs must normalize per row.
        assert jnp.allclose(jnp.sum(jnp.exp(out), axis=-1), 1.0, atol=1e-3)

    print("KERNEL_OK")
</pallas_src>

<mosaic_0001>
module attributes {stable_mosaic.version = 11 : i64} {
  func.func @behavior_mlp_kernel(%arg0: i32, %arg1: memref<8x10xbf16, #tpu.memory_space<vmem>>, %arg2: memref<10x64xbf16, #tpu.memory_space<vmem>>, %arg3: memref<64x64xbf16, #tpu.memory_space<vmem>>, %arg4: memref<64x64xbf16, #tpu.memory_space<vmem>>, %arg5: memref<64x32xbf16, #tpu.memory_space<vmem>>, %arg6: memref<32x128xbf16, #tpu.memory_space<vmem>>, %arg7: memref<5x128xf32, #tpu.memory_space<vmem>>, %arg8: memref<8x128xf32, #tpu.memory_space<vmem>>) attributes {dimension_semantics = [#tpu.dimension_semantics<parallel>], iteration_bounds = array<i64: 1>, scalar_prefetch = 0 : i64, scratch_operands = 0 : i64, tpu.core_type = #tpu.core_type<tc>, window_params = [{transform_indices = @transform_0, window_bounds = array<i64: 8, 10>}, {pipeline_mode = #tpu.pipeline_mode<synchronous>, transform_indices = @transform_1, window_bounds = array<i64: 10, 64>}, {pipeline_mode = #tpu.pipeline_mode<synchronous>, transform_indices = @transform_2, window_bounds = array<i64: 64, 64>}, {pipeline_mode = #tpu.pipeline_mode<synchronous>, transform_indices = @transform_3, window_bounds = array<i64: 64, 64>}, {pipeline_mode = #tpu.pipeline_mode<synchronous>, transform_indices = @transform_4, window_bounds = array<i64: 64, 32>}, {pipeline_mode = #tpu.pipeline_mode<synchronous>, transform_indices = @transform_5, window_bounds = array<i64: 32, 128>}, {pipeline_mode = #tpu.pipeline_mode<synchronous>, transform_indices = @transform_6, window_bounds = array<i64: 5, 128>}, {transform_indices = @transform_7, window_bounds = array<i64: 8, 128>}]} {
    %c0 = arith.constant 0 : index
    %c0_0 = arith.constant 0 : index
    %0 = vector.load %arg1[%c0, %c0_0] : memref<8x10xbf16, #tpu.memory_space<vmem>>, vector<8x10xbf16>
    %c0_1 = arith.constant 0 : index
    %c0_2 = arith.constant 0 : index
    %1 = vector.load %arg2[%c0_1, %c0_2] : memref<10x64xbf16, #tpu.memory_space<vmem>>, vector<10x64xbf16>
    %cst = arith.constant dense<0.000000e+00> : vector<8x64xf32>
    %2 = tpu.matmul %0, %1, %cst {dimension_numbers = #tpu.dot_dimension_numbers<[1], [0], [0], [1], [0, 0, 1, 1], [], []>} : vector<8x10xbf16>, vector<10x64xbf16>, vector<8x64xf32> -> vector<8x64xf32>
    %c0_3 = arith.constant 0 : index
    %c0_4 = arith.constant 0 : index
    %3 = vector.load %arg7[%c0_3, %c0_4] : memref<5x128xf32, #tpu.memory_space<vmem>>, vector<1x64xf32>
    %4 = vector.broadcast %3 : vector<1x64xf32> to vector<8x64xf32>
    %5 = arith.addf %2, %4 : vector<8x64xf32>
    %cst_5 = arith.constant 0.000000e+00 : f32
    %6 = vector.broadcast %cst_5 : f32 to vector<8x64xf32>
    %7 = arith.maximumf %5, %6 : vector<8x64xf32>
    %8 = arith.truncf %7 : vector<8x64xf32> to vector<8x64xbf16>
    %c0_6 = arith.constant 0 : index
    %c0_7 = arith.constant 0 : index
    %9 = vector.load %arg3[%c0_6, %c0_7] : memref<64x64xbf16, #tpu.memory_space<vmem>>, vector<64x64xbf16>
    %cst_8 = arith.constant dense<0.000000e+00> : vector<8x64xf32>
    %10 = tpu.matmul %8, %9, %cst_8 {dimension_numbers = #tpu.dot_dimension_numbers<[1], [0], [0], [1], [0, 0, 1, 1], [], []>} : vector<8x64xbf16>, vector<64x64xbf16>, vector<8x64xf32> -> vector<8x64xf32>
    %c1 = arith.constant 1 : index
    %c0_9 = arith.constant 0 : index
    %11 = vector.load %arg7[%c1, %c0_9] : memref<5x128xf32, #tpu.memory_space<vmem>>, vector<1x64xf32>
    %12 = vector.broadcast %11 : vector<1x64xf32> to vector<8x64xf32>
    %13 = arith.addf %10, %12 : vector<8x64xf32>
    %cst_10 = arith.constant 0.000000e+00 : f32
    %14 = vector.broadcast %cst_10 : f32 to vector<8x64xf32>
    %15 = arith.maximumf %13, %14 : vector<8x64xf32>
    %16 = arith.truncf %15 : vector<8x64xf32> to vector<8x64xbf16>
    %c0_11 = arith.constant 0 : index
    %c0_12 = arith.constant 0 : index
    %17 = vector.load %arg4[%c0_11, %c0_12] : memref<64x64xbf16, #tpu.memory_space<vmem>>, vector<64x64xbf16>
    %cst_13 = arith.constant dense<0.000000e+00> : vector<8x64xf32>
    %18 = tpu.matmul %16, %17, %cst_13 {dimension_numbers = #tpu.dot_dimension_numbers<[1], [0], [0], [1], [0, 0, 1, 1], [], []>} : vector<8x64xbf16>, vector<64x64xbf16>, vector<8x64xf32> -> vector<8x64xf32>
    %c2 = arith.constant 2 : index
    %c0_14 = arith.constant 0 : index
    %19 = vector.load %arg7[%c2, %c0_14] : memref<5x128xf32, #tpu.memory_space<vmem>>, vector<1x64xf32>
    %20 = vector.broadcast %19 : vector<1x64xf32> to vector<8x64xf32>
    %21 = arith.addf %18, %20 : vector<8x64xf32>
    %cst_15 = arith.constant 0.000000e+00 : f32
    %22 = vector.broadcast %cst_15 : f32 to vector<8x64xf32>
    %23 = arith.maximumf %21, %22 : vector<8x64xf32>
    %24 = arith.truncf %23 : vector<8x64xf32> to vector<8x64xbf16>
    %c0_16 = arith.constant 0 : index
    %c0_17 = arith.constant 0 : index
    %25 = vector.load %arg5[%c0_16, %c0_17] : memref<64x32xbf16, #tpu.memory_space<vmem>>, vector<64x32xbf16>
    %cst_18 = arith.constant dense<0.000000e+00> : vector<8x32xf32>
    %26 = tpu.matmul %24, %25, %cst_18 {dimension_numbers = #tpu.dot_dimension_numbers<[1], [0], [0], [1], [0, 0, 1, 1], [], []>} : vector<8x64xbf16>, vector<64x32xbf16>, vector<8x32xf32> -> vector<8x32xf32>
    %c3 = arith.constant 3 : index
    %c0_19 = arith.constant 0 : index
    %27 = vector.load %arg7[%c3, %c0_19] : memref<5x128xf32, #tpu.memory_space<vmem>>, vector<1x32xf32>
    %28 = vector.broadcast %27 : vector<1x32xf32> to vector<8x32xf32>
    %29 = arith.addf %26, %28 : vector<8x32xf32>
    %cst_20 = arith.constant 0.000000e+00 : f32
    %30 = vector.broadcast %cst_20 : f32 to vector<8x32xf32>
    %31 = arith.maximumf %29, %30 : vector<8x32xf32>
    %32 = arith.truncf %31 : vector<8x32xf32> to vector<8x32xbf16>
    %c0_21 = arith.constant 0 : index
    %c0_22 = arith.constant 0 : index
    %33 = vector.load %arg6[%c0_21, %c0_22] : memref<32x128xbf16, #tpu.memory_space<vmem>>, vector<32x128xbf16>
    %cst_23 = arith.constant dense<0.000000e+00> : vector<8x128xf32>
    %34 = tpu.matmul %32, %33, %cst_23 {dimension_numbers = #tpu.dot_dimension_numbers<[1], [0], [0], [1], [0, 0, 1, 1], [], []>} : vector<8x32xbf16>, vector<32x128xbf16>, vector<8x128xf32> -> vector<8x128xf32>
    %c4 = arith.constant 4 : index
    %c0_24 = arith.constant 0 : index
    %35 = vector.load %arg7[%c4, %c0_24] : memref<5x128xf32, #tpu.memory_space<vmem>>, vector<1x128xf32>
    %36 = vector.broadcast %35 : vector<1x128xf32> to vector<8x128xf32>
    %37 = arith.addf %34, %36 : vector<8x128xf32>
    %38 = vector.extract_strided_slice %37 {offsets = [0, 0], sizes = [8, 4], strides = [1, 1]} : vector<8x128xf32> to vector<8x4xf32>
    %cst_25 = arith.constant dense<0xFF800000> : vector<8xf32>
    %39 = vector.multi_reduction <maximumf>, %38, %cst_25 [1] : vector<8x4xf32> to vector<8xf32>
    %40 = vector.shape_cast %39 : vector<8xf32> to vector<8x1xf32>
    %41 = vector.broadcast %40 : vector<8x1xf32> to vector<8x4xf32>
    %42 = arith.subf %38, %41 : vector<8x4xf32>
    %43 = math.exp %42 : vector<8x4xf32>
    %cst_26 = arith.constant dense<0.000000e+00> : vector<8xf32>
    %44 = vector.multi_reduction <add>, %43, %cst_26 [1] : vector<8x4xf32> to vector<8xf32>
    %45 = vector.shape_cast %44 : vector<8xf32> to vector<8x1xf32>
    %46 = math.log %45 : vector<8x1xf32>
    %47 = arith.addf %40, %46 : vector<8x1xf32>
    %48 = vector.broadcast %47 : vector<8x1xf32> to vector<8x128xf32>
    %49 = arith.subf %37, %48 : vector<8x128xf32>
    %c0_27 = arith.constant 0 : index
    %c0_28 = arith.constant 0 : index
    %50 = vector.load %arg8[%c0_27, %c0_28] : memref<8x128xf32, #tpu.memory_space<vmem>>, vector<8x128xf32>
    tpu.vector_store %arg8[%c0_27, %c0_28], %49 {strides = array<i32>} : memref<8x128xf32, #tpu.memory_space<vmem>>, vector<8x128xf32>,
    return
  }
  func.func @transform_0(%arg0: i32) -> (i32, i32) {
    %c0_i32 = arith.constant 0 : i32
    %c0_i32_0 = arith.constant 0 : i32
    return %arg0, %c0_i32 : i32, i32
  }
  func.func @transform_1(%arg0: i32) -> (i32, i32) {
    %c0_i32 = arith.constant 0 : i32
    %c0_i32_0 = arith.constant 0 : i32
    %c0_i32_1 = arith.constant 0 : i32
    return %c0_i32, %c0_i32_0 : i32, i32
  }
  func.func @transform_2(%arg0: i32) -> (i32, i32) {
    %c0_i32 = arith.constant 0 : i32
    %c0_i32_0 = arith.constant 0 : i32
    %c0_i32_1 = arith.constant 0 : i32
    return %c0_i32, %c0_i32_0 : i32, i32
  }
  func.func @transform_3(%arg0: i32) -> (i32, i32) {
    %c0_i32 = arith.constant 0 : i32
    %c0_i32_0 = arith.constant 0 : i32
    %c0_i32_1 = arith.constant 0 : i32
    return %c0_i32, %c0_i32_0 : i32, i32
  }
  func.func @transform_4(%arg0: i32) -> (i32, i32) {
    %c0_i32 = arith.constant 0 : i32
    %c0_i32_0 = arith.constant 0 : i32
    %c0_i32_1 = arith.constant 0 : i32
    return %c0_i32, %c0_i32_0 : i32, i32
  }
  func.func @transform_5(%arg0: i32) -> (i32, i32) {
    %c0_i32 = arith.constant 0 : i32
    %c0_i32_0 = arith.constant 0 : i32
    %c0_i32_1 = arith.constant 0 : i32
    return %c0_i32, %c0_i32_0 : i32, i32
  }
  func.func @transform_6(%arg0: i32) -> (i32, i32) {
    %c0_i32 = arith.constant 0 : i32
    %c0_i32_0 = arith.constant 0 : i32
    %c0_i32_1 = arith.constant 0 : i32
    return %c0_i32, %c0_i32_0 : i32, i32
  }
  func.func @transform_7(%arg0: i32) -> (i32, i32) {
    %c0_i32 = arith.constant 0 : i32
    %c0_i32_0 = arith.constant 0 : i32
    return %arg0, %c0_i32 : i32, i32
  }
}

</mosaic_0001>

<bundles_post_ra>
// kernel: behavior_forward.1
= control target key start
LH: loop header
LB: loop body
LE: loop exit
PB: predicated region body
PF: predicated region fallthrough
CT: control target
= control target key end

     0   :  { %12 = vsyncpa [#allocation3], 0  ;;  %s773_s0 = inlined_call_operand.vmem [shape: bf16[8,10], index: 0, kind: input, shape index: {}]   ;;  %s774_s1 = inlined_call_operand.hbm [shape: bf16[10,64], index: 1, kind: input, shape index: {}]   ;;  %s775_s2 = inlined_call_operand.vmem [shape: bf16[64,64], index: 2, kind: input, shape index: {}]   ;;  %s776_s3 = inlined_call_operand.vmem [shape: bf16[64,64], index: 3, kind: input, shape index: {}]   ;;  %s777_s4 = inlined_call_operand.vmem [shape: bf16[64,32], index: 4, kind: input, shape index: {}]   ;;  %s778_s5 = inlined_call_operand.hbm [shape: bf16[32,128], index: 5, kind: input, shape index: {}]   ;;  %s779_s6 = inlined_call_operand.hbm [shape: f32[5,128], index: 6, kind: input, shape index: {}]   ;;  %s780_s7 = inlined_call_operand.vmem [shape: f32[8,128], index: 7, kind: output, shape index: {}]  }
   0x1   :  { %13 = vsyncpa [#allocation5], 0  ;;  %s647_s24 = smov [#allocation4]   ;;  %s648_s26 = smov [#allocation2]  }
   0x2   :  { %s39_s25 = sshll.u32 %s647_s24, 4  ;;  %s21_s27 = sshll.u32 %s648_s26, 4  ;;  %s40_s25 = int_to_ptr.vmem [resolvable:$true] %s39_s25  ;;  %s22_s27 = int_to_ptr.vmem [resolvable:$true] %s21_s27 }
   0x3   :  { %s591_s28 = scalar_lea.vmem %s40_s25, 256  ;;  %p596_p1 = scmp.lt.s32.totalorder %s40_s25, %s40_s25 }
   0x4   :  { %p592_p0 = scmp.ne.s32.totalorder %s40_s25, %s591_s28  ;;  %p597_p2 = scmp.lt.s32.totalorder %s591_s28, %s591_s28 }
   0x6   :  { %p598_p3 = por %p597_p2, %p596_p1 }
   0x8   :  { %p599_p4 = pnand %p598_p3, %p592_p0 }
   0xa   :  { %602 = shalt.err (!%p599_p4)
}
   0xb   :  { %s649_s29 = smov 64   ;;  %s650_s30 = smov 4  }
   0xc   :  { %45 = dma.hbm_to_vmem [thread:$0]  %s778_s5, 256, %s40_s25, [#allocation5], %s649_s29, %s649_s29, %s650_s30  }
   0xd   :  { %s611_s10 = scalar_lea.vmem %s22_s27, 128  ;;  %p616_p6 = scmp.lt.s32.totalorder %s22_s27, %s22_s27 }
   0xe   :  { %p612_p5 = scmp.ne.s32.totalorder %s22_s27, %s611_s10  ;;  %p617_p7 = scmp.lt.s32.totalorder %s611_s10, %s611_s10 }
  0x10   :  { %p618_p8 = por %p617_p7, %p616_p6 }
  0x12   :  { %p619_p9 = pnand %p618_p8, %p612_p5 }
  0x14   :  { %622 = shalt.err (!%p619_p9)
}
  0x15   :  { %27 = dma.hbm_to_vmem [thread:$0]  %s774_s1, 128, %s22_s27, [#allocation3], %s649_s29, %s649_s29, %s650_s30  }
  0x16   :  { %s651_s13 = smov [#allocation6]  }
  0x17   :  { %s52_s14 = sshll.u32 %s651_s13, 4  ;;  %s53_s14 = int_to_ptr.vmem [resolvable:$true] %s52_s14 }
  0x18   :  { %s631_s15 = scalar_lea.vmem %s53_s14, 128  ;;  %p636_p11 = scmp.lt.s32.totalorder %s53_s14, %s53_s14 }
  0x19   :  { %p632_p10 = scmp.ne.s32.totalorder %s53_s14, %s631_s15  ;;  %p637_p12 = scmp.lt.s32.totalorder %s631_s15, %s631_s15 }
  0x1b   :  { %p638_p13 = por %p637_p12, %p636_p11 }
  0x1d   :  { %p639_p0 = pnand %p638_p13, %p632_p10 }
  0x1f   :  { %642 = shalt.err (!%p639_p0)
}
  0x20   :  { %55 = dma.hbm_to_vmem [thread:$0]  %s779_s6, 128, %s53_s14, [#allocation5]  }
  0x21   :  { %643 = dma.done.wait [#allocation3], 128  }
  0x22   :  { %644 = vsyncadd [#allocation3], 4294967168 }
  0x23   :  { %645 = dma.done.wait [#allocation5], 384  }
  0x24   :  { %646 = vsyncadd [#allocation5], 4294966912  ;;  %v652_v0 = vmov 0.0   ;;  %vm653_vm0 = vmmov 0   ;;  %vm83_vm1 = vcmask 1044480   ;;  %v565_v3 = vld [vmem:[%s775_s2 + $0x18] sm:$0xff]  }
  0x25   :  { %507 = vmatprep.subr.bf16.mxu0 %v652_v0  ;;  %509 = vmatprep.mubr.msk.bf16.mxu0 %vm653_vm0, %v652_v0  ;;  %v564_v1 = vld [vmem:[#allocation2] sm:$0x1f]   ;;  %vm79_vm2 = vcmask 80896   ;;  %v566_v5 = vld [vmem:[%s775_s2 + $0x10] sm:$0xff]   ;;  %v567_v6 = vld [vmem:[%s775_s2 + $0x8] sm:$0xff]   ;;  %vm166_vm3 = vcmask 523264  }
  0x26   :  { %513 = vmatprep.subr.bf16.mxu1 %v652_v0  ;;  %521 = vmatprep.mubr.msk.bf16.mxu1 %vm653_vm0, %v652_v0  ;;  %v85_v2 = vsel %vm83_vm1, %v564_v1, 0  ;;  %v66_v4 = vld [vmem:[%s773_s0] sm:$0xf]  ;;  %v569_v8 = vld [vmem:[%s776_s3 + $0x18] sm:$0xff]   ;;  %v570_v9 = vld [vmem:[%s776_s3 + $0x10] sm:$0xff]   ;;  %vm397_vm4 = vcmask 261120  }
  0x27   :  { %508 = vmatpush3.bf16.msra.mxu0 %v85_v2  ;;  %514 = vmatpush3.bf16.msra.mxu1 %v565_v3  ;;  %v568_v7 = vld [vmem:[%s775_s2] sm:$0xff]   ;;  %v462_v10 = vld [vmem:[#allocation6] ss:$0 sm:$0xff]  ;;  %v571_v18 = vld [vmem:[%s776_s3 + $0x8] sm:$0xff]   ;;  %vm441_vm5 = vcmask 31744  }
  0x28   :  { %525 = vmatprep.subr.bf16.mxu0 %v652_v0  ;;  %515 = vmatprep.subr.bf16.mxu1 %v652_v0  ;;  %v572_v19 = vld [vmem:[%s776_s3] sm:$0xff]   ;;  %v573_v20 = vld [vmem:[%s777_s4 + $0x18] sm:$0xff]   ;;  %v574_v21 = vld [vmem:[%s777_s4 + $0x10] sm:$0xff]  }
  0x29   :  { %v465_v22 = vld [vmem:[#allocation6 + $0x1] ss:$0 sm:$0xff]  ;;  %v575_v30 = vld [vmem:[%s777_s4 + $0x8] sm:$0xff]   ;;  %v576_v31 = vld [vmem:[%s777_s4] sm:$0xff]  }
  0x2a   :  { %510 = vmatmul.mubr.msk.bf16.vlgmr.msra.gmra.mxu0 %vm79_vm2, %v66_v4  ;;  %v577_v32 = vld [vmem:[#allocation4 + $0x8] sm:$0xff]   ;;  %v471_v33 = vld [vmem:[#allocation6 + $0x2] ss:$0 sm:$0xff]  ;;  %v578_v41 = vld [vmem:[#allocation4] sm:$0xff]  }
  0x2b   :  { %533 = vmatprep.mubr.msk.bf16.mxu0 %vm653_vm0, %v652_v0  ;;  %516 = vmatpush3.bf16.msra.mxu1 %v566_v5  ;;  %v477_v42 = vld [vmem:[#allocation6 + $0x3] ss:$0 sm:$0xff]  ;;  %v483_v50 = vld [vmem:[#allocation6 + $0x4] ss:$0 sm:$0xff] }
  0x2c   :  { %517 = vmatprep.subr.bf16.mxu1 %v652_v0  ;;  %526 = vmatpush3.bf16.msra.mxu0 %v569_v8 }
  0x2d   :  { %527 = vmatprep.subr.bf16.mxu0 %v652_v0 }
  0x2f   :  { %518 = vmatpush3.bf16.msra.mxu1 %v567_v6 }
  0x30   :  { %519 = vmatprep.subr.bf16.mxu1 %v652_v0  ;;  %528 = vmatpush3.bf16.msra.mxu0 %v570_v9 }
  0x31   :  { %529 = vmatprep.subr.bf16.mxu0 %v652_v0 }
  0x33   :  { %520 = vmatpush3.bf16.msra.mxu1 %v568_v7 }
  0x34   :  { %537 = vmatprep.subr.bf16.mxu1 %v652_v0  ;;  %530 = vmatpush3.bf16.msra.mxu0 %v571_v18 }
  0x35   :  { %531 = vmatprep.subr.bf16.mxu0 %v652_v0 }
  0x38   :  { %532 = vmatpush3.bf16.msra.mxu0 %v572_v19 }
  0x39   :  { %549 = vmatprep.subr.bf16.mxu0 %v652_v0 }
  0xea   :  { %v121_v11 = vpop.f32.mrf.mxu0 }
  0xeb   :  { %v122_v12 = vadd.f32 %v462_v10, %v121_v11 }
  0xec   :  { %v511_v13 = vpop.f32.mrf.mxu0 }
  0xed   :  { %v127_v14 = vmax.f32 %v122_v12, 0.0 }
  0xee   :  { %v124_v15 = vpop.f32.mrf.mxu0 }
  0xef   :  { %v128_v16 = vpack.c.bf16 %v127_v14, %v127_v14 }
  0xf0   :  { %v512_v17 = vpop.f32.mrf.mxu0 }
  0xf1   :  { %522 = vmatmul.mubr.msk.bf16.vlgmr.msra.gmra.mxu1 %vm166_vm3, %v128_v16 }
  0xf2   :  { %545 = vmatprep.mubr.msk.bf16.mxu1 %vm653_vm0, %v652_v0  ;;  %538 = vmatpush3.bf16.msra.mxu1 %v573_v20 }
  0xf3   :  { %539 = vmatprep.subr.bf16.mxu1 %v652_v0 }
  0xf6   :  { %540 = vmatpush3.bf16.msra.mxu1 %v574_v21 }
  0xf7   :  { %541 = vmatprep.subr.bf16.mxu1 %v652_v0 }
  0xfa   :  { %542 = vmatpush3.bf16.msra.mxu1 %v575_v30 }
  0xfb   :  { %543 = vmatprep.subr.bf16.mxu1 %v652_v0 }
  0xfe   :  { %544 = vmatpush3.bf16.msra.mxu1 %v576_v31 }
 0x1b1   :  { %v204_v23 = vpop.f32.mrf.mxu1 }
 0x1b2   :  { %v205_v24 = vadd.f32 %v465_v22, %v204_v23 }
 0x1b3   :  { %v523_v25 = vpop.f32.mrf.mxu1 }
 0x1b4   :  { %v210_v26 = vmax.f32 %v205_v24, 0.0 }
 0x1b5   :  { %v207_v27 = vpop.f32.mrf.mxu1 }
 0x1b6   :  { %v211_v28 = vpack.c.bf16 %v210_v26, %v210_v26 }
 0x1b7   :  { %v524_v29 = vpop.f32.mrf.mxu1 }
 0x1b8   :  { %534 = vmatmul.mubr.msk.bf16.vlgmr.msra.gmra.mxu0 %vm166_vm3, %v211_v28 }
 0x1b9   :  { %553 = vmatprep.mubr.msk.bf16.mxu0 %vm653_vm0, %v652_v0  ;;  %550 = vmatpush3.bf16.msra.mxu0 %v577_v32 }
 0x1ba   :  { %551 = vmatprep.subr.bf16.mxu0 %v652_v0 }
 0x1bd   :  { %552 = vmatpush3.bf16.msra.mxu0 %v578_v41 }
 0x278   :  { %v286_v34 = vpop.f32.mrf.mxu0 }
 0x279   :  { %v287_v35 = vadd.f32 %v471_v33, %v286_v34 }
 0x27a   :  { %v535_v36 = vpop.f32.mrf.mxu0 }
 0x27b   :  { %v292_v37 = vmax.f32 %v287_v35, 0.0 }
 0x27c   :  { %v289_v38 = vpop.f32.mrf.mxu0 }
 0x27d   :  { %v293_v39 = vpack.c.bf16 %v292_v37, %v292_v37 }
 0x27e   :  { %v536_v40 = vpop.f32.mrf.mxu0 }
 0x27f   :  { %546 = vmatmul.mubr.msk.bf16.vlgmr.msra.gmra.mxu1 %vm166_vm3, %v293_v39 }
 0x33f   :  { %v368_v43 = vpop.f32.mrf.mxu1 }
 0x340   :  { %v369_v44 = vadd.f32 %v477_v42, %v368_v43 }
 0x341   :  { %v547_v45 = vpop.f32.mrf.mxu1 }
 0x342   :  { %v374_v46 = vmax.f32 %v369_v44, 0.0 }
 0x343   :  { %v371_v47 = vpop.f32.mrf.mxu1 }
 0x344   :  { %v375_v48 = vpack.c.bf16 %v374_v46, %v374_v46 }
 0x345   :  { %v548_v49 = vpop.f32.mrf.mxu1 }
 0x346   :  { %554 = vmatmul.mubr.msk.bf16.vlgmr.msra.gmra.mxu0 %vm397_vm4, %v375_v48 }
 0x406   :  { %v435_v51 = vpop.f32.mrf.mxu0 }
 0x407   :  { %v436_v52 = vadd.f32 %v483_v50, %v435_v51 }
 0x408   :  { %v555_v53 = vpop.f32.mrf.mxu0 }
 0x409   :  { %v442_v54 = vsel %vm441_vm5, %v436_v52, -inf }
 0x40a   :  { %443 = vmax.xlane.f32.xlu0 %v442_v54  ;;  %v438_v55 = vpop.f32.mrf.mxu0 }
 0x40c   :  { %v556_v56 = vpop.f32.mrf.mxu0 }
 0x493   :  { %v444_v57 = vpop.xlane.xlu0 %443 }
 0x494   :  { %v445_v58 = vsub.f32 %v436_v52, %v444_v57 }
 0x496   :  { %v446_v59 = vmul.f32 1.442695, %v445_v58 }
 0x498   :  { %579 = vpow2.f32 %v446_v59 }
 0x4a5   :  { %v580_v60 = vpop.eup %579 }
 0x4a6   :  { %v448_v61 = vsel %vm441_vm5, %v580_v60, 0.0 }
 0x4a7   :  { %449 = vadd.xlane.f32.xlu0 %v448_v61 }
 0x530   :  { %v450_v62 = vpop.xlane.xlu0 %449 }
 0x531   :  { %581 = vlog2.f32 %v450_v62 }
 0x53e   :  { %v582_v63 = vpop.eup %581 }
 0x53f   :  { %v452_v0 = vmul.f32 0.6931472, %v582_v63 }
 0x541   :  { %v453_v1 = vadd.f32 %v452_v0, %v444_v57 }
 0x543   :  { %v454_v2 = vsub.f32 %v436_v52, %v453_v1 }
 0x545   :  { %455 = vst [vmem:[%s780_s7] sm:$0xff] %v454_v2 }
 0x546   :  { %460 = vsyncpa [#allocation3], 1 }
 0x547   :  { %461 = vsyncpa [#allocation5], 1 }

</bundles_post_ra>
